<compile_context>
chip_gen: v7x
topology: tpu7x:2x2x1
jax: 0.10.0
libtpu: 0.0.40
codegen_flags: <defaults>
</compile_context>

<pallas_src>
import functools

import jax
import jax.numpy as jnp
from jax.experimental import pallas as pl
from jax.experimental.pallas import tpu as pltpu


def vot_tagger_kernel(x_ref, w1_ref, b1_ref, w2_ref, b2_ref, out_ref, *,
                      batch, tb, ragged):
    # fc1 (bf16 x bf16 -> f32 accumulate on MXU) + bias + ReLU
    h = jnp.dot(x_ref[...], w1_ref[...],
                preferred_element_type=jnp.float32) + b1_ref[...]        # (TB, hid)
    h = jnp.maximum(h, 0.0)

    # Dropout: identity at inference.

    # fc2 (f32)
    logits = jnp.dot(h, w2_ref[...],
                     preferred_element_type=jnp.float32) + b2_ref[...]   # (TB, out)

    if ragged:
        # Boundary block: rows past `batch` read unspecified x values. Zero the
        # corresponding logits so the (discarded) tail rows stay finite.
        row = (pl.program_id(0) * tb
               + jax.lax.broadcasted_iota(jnp.int32, logits.shape, 0))
        logits = jnp.where(row < batch, logits, 0.0)

    # LogSoftmax over dim=1 (numerically stable)
    m = jnp.max(logits, axis=1, keepdims=True)
    lse = m + jnp.log(jnp.sum(jnp.exp(logits - m), axis=1, keepdims=True))
    out_ref[...] = logits - lse


def _round_up(n, m):
    return ((n + m - 1) // m) * m


@functools.partial(jax.jit, static_argnames=("input_size", "block_b"))
def vot_tagger_forward(x, w1, b1, w2, b2, *, input_size, block_b=4096):
    """x: arbitrary leading dims, flattened to (-1, input_size) like x.view().

    w1: (input_size, hidden)   b1: (hidden,)
    w2: (hidden, out_size)     b2: (out_size,)

    For best throughput pass x already in bf16 (avoids the cast pass here).
    """
    xf = x.reshape(-1, input_size)
    if xf.dtype != jnp.bfloat16:
        xf = xf.astype(jnp.bfloat16)          # stream x in bf16 (half the HBM reads)
    B = xf.shape[0]
    hidden = w1.shape[1]
    out_size = w2.shape[1]

    # Batch tile: multiple of 8 (sublane). Split B across >=2 grid steps when
    # possible so v7x's two TensorCores both get work; cap for VMEM headroom.
    tb = max(8, min(block_b, _round_up(-(-B // 2), 8)))
    grid = (pl.cdiv(B, tb),)
    ragged = (B % tb) != 0

    w1b = w1.astype(jnp.bfloat16)             # resident in VMEM; bf16 MXU path

    cost = pl.CostEstimate(
        flops=2 * B * (input_size * hidden + hidden * out_size),
        transcendentals=B * (out_size + 1),                  # exp per class + log per row
        bytes_accessed=(2 * B * input_size                   # read x (bf16)
                        + 4 * B * out_size                   # write out (f32)
                        + 2 * input_size * hidden            # w1 (bf16)
                        + 4 * (hidden + hidden * out_size + out_size)),  # b1, w2, b2
    )

    kernel = functools.partial(vot_tagger_kernel, batch=B, tb=tb, ragged=ragged)

    out = pl.pallas_call(
        kernel,
        out_shape=jax.ShapeDtypeStruct((B, out_size), jnp.float32),
        grid=grid,
        in_specs=[
            pl.BlockSpec((tb, input_size), lambda i: (i, 0)),        # x: tiled (bf16)
            pl.BlockSpec((input_size, hidden), lambda i: (0, 0)),    # w1: resident
            pl.BlockSpec((1, hidden), lambda i: (0, 0)),             # b1: resident
            pl.BlockSpec((hidden, out_size), lambda i: (0, 0)),      # w2: resident
            pl.BlockSpec((1, out_size), lambda i: (0, 0)),           # b2: resident
        ],
        out_specs=pl.BlockSpec((tb, out_size), lambda i: (i, 0)),
        compiler_params=pltpu.CompilerParams(
            dimension_semantics=("parallel",),       # v7x: shard batch over 2 TCs
            vmem_limit_bytes=32 * 1024 * 1024,       # headroom for big tiles, all gens
        ),
        cost_estimate=cost,
    )(xf, w1b, b1.reshape(1, -1), w2, b2.reshape(1, -1))

    return out


def xavier_uniform(key, fan_in, fan_out):
    # Matches nn.init.xavier_uniform_ (gain=1) on a (fan_out, fan_in) weight,
    # returned already transposed to (fan_in, fan_out) for the kernel.
    bound = (6.0 / (fan_in + fan_out)) ** 0.5
    w = jax.random.uniform(key, (fan_out, fan_in), jnp.float32, -bound, bound)
    return w.T


def linear_bias_init(key, fan_in, fan_out):
    # PyTorch default Linear bias init: U(-1/sqrt(fan_in), 1/sqrt(fan_in))
    bound = 1.0 / (fan_in ** 0.5)
    return jax.random.uniform(key, (fan_out,), jnp.float32, -bound, bound)


def _reference(x, w1, b1, w2, b2, input_size, x_dtype=jnp.float32):
    # x_dtype=bf16 reproduces the kernel's bf16-rounded fc1 inputs (f32 accumulate).
    xf = x.reshape(-1, input_size).astype(x_dtype).astype(jnp.float32)
    w1f = w1.astype(x_dtype).astype(jnp.float32)
    h = jnp.maximum(xf @ w1f + b1, 0.0)
    logits = h @ w2 + b2
    return jax.nn.log_softmax(logits, axis=1)


if __name__ == "__main__":
    input_size, hidden_layer, output_size = 200, 10, 2

    key = jax.random.PRNGKey(0)
    k_x, k_x2, k_w1, k_b1, k_w2, k_b2 = jax.random.split(key, 6)

    w1 = xavier_uniform(k_w1, input_size, hidden_layer)      # (200, 10)
    b1 = linear_bias_init(k_b1, input_size, hidden_layer)    # (10,)
    w2 = xavier_uniform(k_w2, hidden_layer, output_size)     # (10, 2)
    b2 = linear_bias_init(k_b2, hidden_layer, output_size)   # (2,)

    # Test 1: small input (2, 4, 200) -> view(-1, 200) -> (8, 200); single tile.
    x = jax.random.normal(k_x, (2, 4, input_size), jnp.float32)
    probs = vot_tagger_forward(x, w1, b1, w2, b2, input_size=input_size)
    jax.block_until_ready(probs)
    ref_bf16 = _reference(x, w1, b1, w2, b2, input_size, x_dtype=jnp.bfloat16)
    ref_f32 = _reference(x, w1, b1, w2, b2, input_size)
    assert probs.shape == (8, output_size)
    assert jnp.allclose(probs, ref_bf16, atol=2e-4), "mismatch vs bf16 reference (test 1)"
    assert jnp.allclose(probs, ref_f32, atol=5e-2), "mismatch vs f32 reference (test 1)"

    # Test 2: ragged batch (20 rows) with a small tile (block_b=16) to exercise
    # the multi-step grid + in-kernel tail masking path (no jnp.pad anywhere).
    x2 = jax.random.normal(k_x2, (20, input_size), jnp.float32)
    probs2 = vot_tagger_forward(x2, w1, b1, w2, b2,
                                input_size=input_size, block_b=16)
    jax.block_until_ready(probs2)
    ref2_bf16 = _reference(x2, w1, b1, w2, b2, input_size, x_dtype=jnp.bfloat16)
    ref2_f32 = _reference(x2, w1, b1, w2, b2, input_size)
    assert probs2.shape == (20, output_size)
    assert jnp.all(jnp.isfinite(probs2)), "non-finite values in output (test 2)"
    assert jnp.allclose(probs2, ref2_bf16, atol=2e-4), "mismatch vs bf16 reference (test 2)"
    assert jnp.allclose(probs2, ref2_f32, atol=5e-2), "mismatch vs f32 reference (test 2)"

    print("KERNEL_OK")
</pallas_src>

<mosaic_0001>
module attributes {stable_mosaic.version = 11 : i64} {
  func.func @vot_tagger_kernel(%arg0: i32, %arg1: memref<8x200xbf16, #tpu.memory_space<vmem>>, %arg2: memref<200x10xbf16, #tpu.memory_space<vmem>>, %arg3: memref<1x10xf32, #tpu.memory_space<vmem>>, %arg4: memref<10x2xf32, #tpu.memory_space<vmem>>, %arg5: memref<1x2xf32, #tpu.memory_space<vmem>>, %arg6: memref<8x2xf32, #tpu.memory_space<vmem>>) attributes {dimension_semantics = [#tpu.dimension_semantics<parallel>], iteration_bounds = array<i64: 1>, scalar_prefetch = 0 : i64, scratch_operands = 0 : i64, tpu.core_type = #tpu.core_type<tc>, window_params = [{transform_indices = @transform_0, window_bounds = array<i64: 8, 200>}, {pipeline_mode = #tpu.pipeline_mode<synchronous>, transform_indices = @transform_1, window_bounds = array<i64: 200, 10>}, {pipeline_mode = #tpu.pipeline_mode<synchronous>, transform_indices = @transform_2, window_bounds = array<i64: 1, 10>}, {pipeline_mode = #tpu.pipeline_mode<synchronous>, transform_indices = @transform_3, window_bounds = array<i64: 10, 2>}, {pipeline_mode = #tpu.pipeline_mode<synchronous>, transform_indices = @transform_4, window_bounds = array<i64: 1, 2>}, {transform_indices = @transform_5, window_bounds = array<i64: 8, 2>}]} {
    %c0 = arith.constant 0 : index
    %c0_0 = arith.constant 0 : index
    %0 = vector.load %arg1[%c0, %c0_0] : memref<8x200xbf16, #tpu.memory_space<vmem>>, vector<8x200xbf16>
    %c0_1 = arith.constant 0 : index
    %c0_2 = arith.constant 0 : index
    %1 = vector.load %arg2[%c0_1, %c0_2] : memref<200x10xbf16, #tpu.memory_space<vmem>>, vector<200x10xbf16>
    %cst = arith.constant dense<0.000000e+00> : vector<8x10xf32>
    %2 = tpu.matmul %0, %1, %cst {dimension_numbers = #tpu.dot_dimension_numbers<[1], [0], [0], [1], [0, 0, 1, 1], [], []>} : vector<8x200xbf16>, vector<200x10xbf16>, vector<8x10xf32> -> vector<8x10xf32>
    %c0_3 = arith.constant 0 : index
    %c0_4 = arith.constant 0 : index
    %3 = vector.load %arg3[%c0_3, %c0_4] : memref<1x10xf32, #tpu.memory_space<vmem>>, vector<1x10xf32>
    %4 = vector.broadcast %3 : vector<1x10xf32> to vector<8x10xf32>
    %5 = arith.addf %2, %4 : vector<8x10xf32>
    %cst_5 = arith.constant 0.000000e+00 : f32
    %6 = vector.broadcast %cst_5 : f32 to vector<8x10xf32>
    %7 = arith.maximumf %5, %6 : vector<8x10xf32>
    %c0_6 = arith.constant 0 : index
    %c0_7 = arith.constant 0 : index
    %8 = vector.load %arg4[%c0_6, %c0_7] : memref<10x2xf32, #tpu.memory_space<vmem>>, vector<10x2xf32>
    %cst_8 = arith.constant dense<0.000000e+00> : vector<8x2xf32>
    %9 = tpu.matmul %7, %8, %cst_8 {dimension_numbers = #tpu.dot_dimension_numbers<[1], [0], [0], [1], [0, 0, 1, 1], [], []>} : vector<8x10xf32>, vector<10x2xf32>, vector<8x2xf32> -> vector<8x2xf32>
    %c0_9 = arith.constant 0 : index
    %c0_10 = arith.constant 0 : index
    %10 = vector.load %arg5[%c0_9, %c0_10] : memref<1x2xf32, #tpu.memory_space<vmem>>, vector<1x2xf32>
    %11 = vector.broadcast %10 : vector<1x2xf32> to vector<8x2xf32>
    %12 = arith.addf %9, %11 : vector<8x2xf32>
    %cst_11 = arith.constant dense<0xFF800000> : vector<8xf32>
    %13 = vector.multi_reduction <maximumf>, %12, %cst_11 [1] : vector<8x2xf32> to vector<8xf32>
    %14 = vector.shape_cast %13 : vector<8xf32> to vector<8x1xf32>
    %15 = vector.broadcast %14 : vector<8x1xf32> to vector<8x2xf32>
    %16 = arith.subf %12, %15 : vector<8x2xf32>
    %17 = math.exp %16 : vector<8x2xf32>
    %cst_12 = arith.constant dense<0.000000e+00> : vector<8xf32>
    %18 = vector.multi_reduction <add>, %17, %cst_12 [1] : vector<8x2xf32> to vector<8xf32>
    %19 = vector.shape_cast %18 : vector<8xf32> to vector<8x1xf32>
    %20 = math.log %19 : vector<8x1xf32>
    %21 = arith.addf %14, %20 : vector<8x1xf32>
    %22 = vector.broadcast %21 : vector<8x1xf32> to vector<8x2xf32>
    %23 = arith.subf %12, %22 : vector<8x2xf32>
    %c0_13 = arith.constant 0 : index
    %c0_14 = arith.constant 0 : index
    %24 = vector.load %arg6[%c0_13, %c0_14] : memref<8x2xf32, #tpu.memory_space<vmem>>, vector<8x2xf32>
    tpu.vector_store %arg6[%c0_13, %c0_14], %23 {strides = array<i32>} : memref<8x2xf32, #tpu.memory_space<vmem>>, vector<8x2xf32>,
    return
  }
  func.func @transform_0(%arg0: i32) -> (i32, i32) {
    %c0_i32 = arith.constant 0 : i32
    %c0_i32_0 = arith.constant 0 : i32
    return %arg0, %c0_i32 : i32, i32
  }
  func.func @transform_1(%arg0: i32) -> (i32, i32) {
    %c0_i32 = arith.constant 0 : i32
    %c0_i32_0 = arith.constant 0 : i32
    %c0_i32_1 = arith.constant 0 : i32
    return %c0_i32, %c0_i32_0 : i32, i32
  }
  func.func @transform_2(%arg0: i32) -> (i32, i32) {
    %c0_i32 = arith.constant 0 : i32
    %c0_i32_0 = arith.constant 0 : i32
    %c0_i32_1 = arith.constant 0 : i32
    return %c0_i32, %c0_i32_0 : i32, i32
  }
  func.func @transform_3(%arg0: i32) -> (i32, i32) {
    %c0_i32 = arith.constant 0 : i32
    %c0_i32_0 = arith.constant 0 : i32
    %c0_i32_1 = arith.constant 0 : i32
    return %c0_i32, %c0_i32_0 : i32, i32
  }
  func.func @transform_4(%arg0: i32) -> (i32, i32) {
    %c0_i32 = arith.constant 0 : i32
    %c0_i32_0 = arith.constant 0 : i32
    %c0_i32_1 = arith.constant 0 : i32
    return %c0_i32, %c0_i32_0 : i32, i32
  }
  func.func @transform_5(%arg0: i32) -> (i32, i32) {
    %c0_i32 = arith.constant 0 : i32
    %c0_i32_0 = arith.constant 0 : i32
    return %arg0, %c0_i32 : i32, i32
  }
}

</mosaic_0001>

<bundles_post_ra>
// kernel: vot_tagger_forward.1
= control target key start
LH: loop header
LB: loop body
LE: loop exit
PB: predicated region body
PF: predicated region fallthrough
CT: control target
= control target key end

     0   :  { %v348_v0 = vmov 0   ;;  %vm135_vm0 = vcmask 588800   ;;  %vm139_vm1 = vcmask 1043456   ;;  %vm197_vm2 = vcmask 1041408   ;;  %s443_s1 = inlined_call_operand.vmem [shape: bf16[200,10], index: 1, kind: input, shape index: {}]   ;;  %s444_s0 = inlined_call_operand.vmem [shape: bf16[8,200], index: 0, kind: input, shape index: {}]   ;;  %s445_s3 = inlined_call_operand.vmem [shape: f32[10,2], index: 3, kind: input, shape index: {}]   ;;  %s446_s2 = inlined_call_operand.vmem [shape: f32[1,10], index: 2, kind: input, shape index: {}]   ;;  %s447_s4 = inlined_call_operand.vmem [shape: f32[1,2], index: 4, kind: input, shape index: {}]   ;;  %s448_s5 = inlined_call_operand.vmem [shape: f32[8,2], index: 5, kind: output, shape index: {}]  }
   0x1   :  { %143 = vmatprep.subr.bf16.mxu0 %v348_v0  ;;  %v329_v1 = vld [vmem:[%s443_s1] sm:$0xff]   ;;  %v330_v2 = vld [vmem:[%s443_s1 + $0x8] sm:$0xff]   ;;  %v331_v3 = vld [vmem:[%s443_s1 + $0x10] sm:$0xff]   ;;  %v349_v21 = vmov 0.0|0.0   ;;  %vm350_vm3 = vmmov 1   ;;  %vm351_vm5 = vmmov 0  }
   0x2   :  { %144 = vmatpush1.bf16.msra.mxu0 %v329_v1  ;;  %v332_v4 = vld [vmem:[%s443_s1 + $0x18] sm:$0xff]   ;;  %v21_v5 = vld [vmem:[%s444_s0] sm:$0xff]  ;;  %v334_v8 = vld [vmem:[%s443_s1 + $0x28] sm:$0xff]   ;;  %320 = vmatprep.subr.bf16.mxu1 %v349_v21  ;;  %v352_v22 = vmov 0.0   ;;  %vm193_vm6 = vcmask 80896   ;;  %vm271_vm7 = vcmask 15360  }
   0x3   :  { %145 = vmatprep.subr.bf16.mxu0 %v348_v0  ;;  %v292_v6 = vcombine.high %v21_v5, %v21_v5  ;;  %v333_v7 = vld [vmem:[%s443_s1 + $0x20] sm:$0xff]   ;;  %v335_v9 = vld [vmem:[%s443_s1 + $0x30] sm:$0xff]   ;;  %v336_v10 = vld [vmem:[%s443_s1 + $0x38] sm:$0xff]   ;;  %v291_v17 = vcombine.low %v21_v5, %v21_v5  ;;  %317 = vmatprep.mubr.msk.f32.mxu1 %vm351_vm5, %v352_v22 }
   0x4   :  { %v337_v11 = vld [vmem:[%s443_s1 + $0x40] sm:$0xff]   ;;  %v338_v12 = vld [vmem:[%s443_s1 + $0x48] sm:$0xff]   ;;  %v339_v13 = vld [vmem:[%s443_s1 + $0x50] sm:$0xff]  }
   0x5   :  { %306 = vmatprep.mubr.msk.bf16.mxu0 %vm135_vm0, %v292_v6  ;;  %v340_v14 = vld [vmem:[%s443_s1 + $0x58] sm:$0xff]   ;;  %v341_v15 = vld [vmem:[%s443_s1 + $0x60] ss:$0 sps:$4 sm:$0xff]   ;;  %v185_v19 = vld [vmem:[%s445_s3 + $0x8] sm:$0x3] }
   0x6   :  { %146 = vmatpush1.bf16.msra.mxu0 %v330_v2  ;;  %v141_v16 = vsel %vm139_vm1, %v341_v15, 0  ;;  %v184_v18 = vld [vmem:[%s445_s3] sm:$0xff]  ;;  %vm322_vm4 = vmpackc.low %vm197_vm2, %vm350_vm3 }
   0x7   :  { %147 = vmatprep.subr.bf16.mxu0 %v348_v0  ;;  %v321_v20 = vpack.c.bf16 %v185_v19, %v184_v18  ;;  %v290_v23 = vld [vmem:[%s446_s2] ss:$0 sm:$0xff] }
   0x8   :  { %v307_v30 = vld [vmem:[%s447_s4] ss:$0 sm:$0xff] }
   0x9   :  { %323 = vmatpush3.bf16.msk.msra.mxu1 %vm322_vm4, %v321_v20 }
   0xa   :  { %148 = vmatpush1.bf16.msra.mxu0 %v331_v3 }
   0xb   :  { %149 = vmatprep.subr.bf16.mxu0 %v348_v0 }
   0xe   :  { %150 = vmatpush1.bf16.msra.mxu0 %v332_v4 }
   0xf   :  { %151 = vmatprep.subr.bf16.mxu0 %v348_v0 }
  0x12   :  { %152 = vmatpush1.bf16.msra.mxu0 %v333_v7 }
  0x13   :  { %153 = vmatprep.subr.bf16.mxu0 %v348_v0 }
  0x16   :  { %154 = vmatpush1.bf16.msra.mxu0 %v334_v8 }
  0x17   :  { %155 = vmatprep.subr.bf16.mxu0 %v348_v0 }
  0x1a   :  { %156 = vmatpush1.bf16.msra.mxu0 %v335_v9 }
  0x1b   :  { %157 = vmatprep.subr.bf16.mxu0 %v348_v0 }
  0x1e   :  { %158 = vmatpush1.bf16.msra.mxu0 %v336_v10 }
  0x1f   :  { %159 = vmatprep.subr.bf16.mxu0 %v348_v0 }
  0x22   :  { %160 = vmatpush1.bf16.msra.mxu0 %v337_v11 }
  0x23   :  { %161 = vmatprep.subr.bf16.mxu0 %v348_v0 }
  0x26   :  { %162 = vmatpush1.bf16.msra.mxu0 %v338_v12 }
  0x27   :  { %163 = vmatprep.subr.bf16.mxu0 %v348_v0 }
  0x2a   :  { %164 = vmatpush1.bf16.msra.mxu0 %v339_v13 }
  0x2b   :  { %165 = vmatprep.subr.bf16.mxu0 %v348_v0 }
  0x2e   :  { %166 = vmatpush1.bf16.msra.mxu0 %v340_v14 }
  0x2f   :  { %167 = vmatprep.subr.bf16.mxu0 %v348_v0 }
  0x32   :  { %168 = vmatpush1.bf16.msra.mxu0 %v141_v16 }
  0x35   :  { %176 = vmatmul.mubr.bf16.vlgmr.msra.gmra.mrb[0].mxu0 %v291_v17 }
 0x108   :  { %v177_v24 = vpop.f32.mrb[0].mxu0 }
 0x109   :  { %v178_v25 = vadd.f32 %v290_v23, %v177_v24  ;;  %v179_v26 = vpop.f32.mrb[1].mxu0 }
 0x10a   :  { %v180_v27 = vpop.f32.mrb[2].mxu0 }
 0x10b   :  { %v183_v28 = vmax.f32 %v178_v25, 0.0  ;;  %v181_v29 = vpop.f32.mrb[3].mxu0 }
 0x10d   :  { %318 = vmatmul.mubr.msk.f32.vlgmr.msra.gmra.mrb[0].mxu1 %vm193_vm6, %v183_v28 }
 0x1e0   :  { %v267_v31 = vpop.f32.mrb[0].mxu1 }
 0x1e1   :  { %v268_v32 = vadd.f32 %v307_v30, %v267_v31  ;;  %v319_v33 = vpop.f32.mrb[1].mxu1 }
 0x1e3   :  { %v272_v34 = vsel %vm271_vm7, %v268_v32, -inf }
 0x1e4   :  { %273 = vmax.xlane.f32.xlu0 %v272_v34 }
 0x271   :  { %v274_v35 = vpop.xlane.xlu0 %273 }
 0x272   :  { %v275_v36 = vsub.f32 %v268_v32, %v274_v35 }
 0x274   :  { %v276_v37 = vmul.f32 1.442695, %v275_v36 }
 0x276   :  { %344 = vpow2.f32 %v276_v37 }
 0x280   :  { %v345_v38 = vpop.eup %344 }
 0x281   :  { %v278_v39 = vsel %vm271_vm7, %v345_v38, 0.0 }
 0x282   :  { %279 = vadd.xlane.f32.xlu0 %v278_v39 }
 0x30f   :  { %v280_v40 = vpop.xlane.xlu0 %279 }
 0x310   :  { %346 = vlog2.f32 %v280_v40 }
 0x31a   :  { %v347_v41 = vpop.eup %346 }
 0x31b   :  { %v282_v42 = vmul.f32 0.6931472, %v347_v41 }
 0x31d   :  { %v283_v43 = vadd.f32 %v282_v42, %v274_v35 }
 0x31f   :  { %v284_v44 = vsub.f32 %v268_v32, %v283_v43 }
 0x321   :  { %285 = vst.msk [vmem:[%s448_s5] sm:$0xff] %vm271_vm7, %v284_v44 }

</bundles_post_ra>
